<compile_context>
chip_gen: v7x
topology: tpu7x:2x2x1
jax: 0.10.0
libtpu: 0.0.40
codegen_flags: <defaults>
</compile_context>

<pallas_src>
import functools

import jax
import jax.numpy as jnp
from jax import lax
from jax.experimental import pallas as pl
from jax.experimental.pallas import tpu as pltpu

EPS = 1e-5           # nn.BatchNorm1d default eps
LEAKY_SLOPE = 0.01   # nn.LeakyReLU default negative_slope

_LANE = 128
_SUBLANE = 8
_TILE_VMEM_BUDGET = 20 * 1024 * 1024   # budget for x double-buffer + activations
_VMEM_LIMIT_BYTES = 32 * 1024 * 1024   # safe on v5e/v6e (128 MiB) and v7x (64 MiB)
_MAX_BATCH_TILE = 8192


def _round_up(x, m):
    return ((x + m - 1) // m) * m


def _mlp_kernel(x_ref, w1_ref, b1_ref, w2_ref, b2_ref, o_ref):
    # x: (TB, in_size); w1: (in_size, FIL_PAD); b1/w2: (1, FIL_PAD); b2: SMEM (1,)
    x = x_ref[...]

    # fused bn1 + fc1 + bn2 on the MXU, f32 accumulation
    h = jnp.dot(x, w1_ref[...], preferred_element_type=jnp.float32)
    h = h + b1_ref[...]                                   # (TB, FIL_PAD), f32

    # LeakyReLU (VPU); padded fil lanes stay 0 (b1/w2 are zero-padded)
    h = jnp.where(h >= 0, h, LEAKY_SLOPE * h)

    # fc2 with out_features == 1: VPU multiply + XLU lane reduce (no MXU)
    out = jnp.sum(h * w2_ref[...], axis=-1, keepdims=True) + b2_ref[0]

    o_ref[...] = out.astype(o_ref.dtype)


def fuse_params(params):
    """Fold eval-mode BN1/BN2 into fc1 and pad fil_num to a lane multiple.

    Call once outside the per-step path (or under a surrounding jit so it
    constant-folds).  Exact for the inference path: Dropout = identity and
    both BatchNorms use running statistics.
    """
    fil_num, in_size = params["w1"].shape

    s1 = params["bn1_gamma"] * lax.rsqrt(params["bn1_var"] + EPS)
    t1 = params["bn1_beta"] - params["bn1_mean"] * s1
    s2 = params["bn2_gamma"] * lax.rsqrt(params["bn2_var"] + EPS)
    t2 = params["bn2_beta"] - params["bn2_mean"] * s2

    w1 = params["w1"].astype(jnp.float32)                       # (fil, in)
    w1p = (w1.T * s1[:, None]) * s2[None, :]                    # (in, fil)
    b1p = (params["b1"] + w1 @ t1) * s2 + t2                    # (fil,)
    w2_row = params["w2"].reshape(1, -1).astype(jnp.float32)    # (1, fil)
    b2 = params["b2"].reshape(1).astype(jnp.float32)            # (1,)

    fil_pad = _round_up(max(fil_num, _LANE), _LANE)
    if fil_pad != fil_num:
        pad = fil_pad - fil_num
        w1p = jnp.pad(w1p, ((0, 0), (0, pad)))
        b1p = jnp.pad(b1p, (0, pad))
        w2_row = jnp.pad(w2_row, ((0, 0), (0, pad)))

    return {
        "w1": w1p,                        # (in_size, fil_pad) f32
        "b1": b1p.reshape(1, fil_pad),    # (1, fil_pad)      f32
        "w2": w2_row,                     # (1, fil_pad)      f32
        "b2": b2,                         # (1,)              f32 (SMEM scalar)
    }


def _pick_batch_tile(B, in_size, fil_pad):
    """Largest batch tile fitting the VMEM budget, keeping >=2 grid steps."""
    if B <= 1024:
        return B  # one full-array block: no edge masking, minimal overhead
    # Per-row VMEM: double-buffered x tile + fc1 activation temporaries.
    per_row_bytes = (2 * in_size + 3 * fil_pad + 16) * 4
    tb = _TILE_VMEM_BUDGET // per_row_bytes
    tb = max(256, min(_MAX_BATCH_TILE, tb))
    # Keep >= 2 grid steps so dimension_semantics=("parallel",) can feed both
    # TensorCores on v7x.
    tb = min(tb, _round_up(-(-B // 2), 256))
    tb = max(256, (tb // 256) * 256)
    return B if tb >= B else tb


@functools.partial(jax.jit, static_argnames=("batch_tile",))
def mlp_forward(x, fused, *, batch_tile=None):
    """Eval-mode _MLP forward.  x: (B, in_size); returns (B, 1) float32."""
    B, in_size = x.shape
    w1 = fused["w1"]
    fil_pad = w1.shape[1]
    assert w1.shape[0] == in_size

    # x is streamed exactly as handed to us: no wrapper-side pad / dtype
    # convert (each would be an extra full HBM read+write of the dominant
    # stream).  If the producer supplies bf16 x we run a bf16 MXU matmul
    # (f32 accumulation) and only convert the tiny weight matrix.
    if w1.dtype != x.dtype:
        w1 = w1.astype(x.dtype)

    if batch_tile is None:
        tb = _pick_batch_tile(B, in_size, fil_pad)
    else:
        tb = min(batch_tile, B)
        if tb < B:
            tb = max(_SUBLANE, (tb // _SUBLANE) * _SUBLANE)

    grid = (pl.cdiv(B, tb),)
    full = lambda shape: pl.BlockSpec(shape, lambda i: (0, 0))

    # The last x block may run past B; Pallas masks the corresponding output
    # rows on store.  This is safe only because every output row depends
    # solely on its own input row (no cross-row reduction in the kernel).
    out = pl.pallas_call(
        _mlp_kernel,
        out_shape=jax.ShapeDtypeStruct((B, 1), jnp.float32),
        grid_spec=pltpu.PrefetchScalarGridSpec(
            num_scalar_prefetch=0,
            grid=grid,
            in_specs=[
                pl.BlockSpec((tb, in_size), lambda i: (i, 0)),      # x tile
                full((in_size, fil_pad)),                           # fused W1
                full((1, fil_pad)),                                 # fused b1
                full((1, fil_pad)),                                 # w2 row
                pl.BlockSpec(memory_space=pltpu.MemorySpace.SMEM),  # b2 scalar
            ],
            out_specs=pl.BlockSpec((tb, 1), lambda i: (i, 0)),
        ),
        compiler_params=pltpu.CompilerParams(
            dimension_semantics=("parallel",),
            vmem_limit_bytes=_VMEM_LIMIT_BYTES,
        ),
    )(x, w1, fused["b1"], fused["w2"], fused["b2"])

    return out


def init_params(key, in_size, fil_num):
    """Deterministic parameter init matching the module's shapes."""
    k1, k2, k3, k4, k5, k6 = jax.random.split(key, 6)
    bound1 = 1.0 / jnp.sqrt(in_size)
    bound2 = 1.0 / jnp.sqrt(fil_num)
    return {
        # BatchNorm1d(in_size): gamma=1, beta=0 at init; non-trivial running
        # stats so the BN folding is actually exercised.
        "bn1_gamma": jnp.ones((in_size,), jnp.float32),
        "bn1_beta": jnp.zeros((in_size,), jnp.float32),
        "bn1_mean": 0.1 * jax.random.normal(k5, (in_size,), jnp.float32),
        "bn1_var": jnp.ones((in_size,), jnp.float32)
                   + 0.1 * jax.random.uniform(k6, (in_size,), jnp.float32),
        # Linear(in_size, fil_num): weight (fil_num, in_size), bias (fil_num,)
        "w1": jax.random.uniform(k1, (fil_num, in_size), jnp.float32, -bound1, bound1),
        "b1": jax.random.uniform(k2, (fil_num,), jnp.float32, -bound1, bound1),
        # BatchNorm1d(fil_num)
        "bn2_gamma": jnp.ones((fil_num,), jnp.float32),
        "bn2_beta": jnp.zeros((fil_num,), jnp.float32),
        "bn2_mean": jnp.zeros((fil_num,), jnp.float32),
        "bn2_var": jnp.ones((fil_num,), jnp.float32),
        # Linear(fil_num, 1)
        "w2": jax.random.uniform(k3, (1, fil_num), jnp.float32, -bound2, bound2),
        "b2": jax.random.uniform(k4, (1,), jnp.float32, -bound2, bound2),
    }


def _ref_forward(x, p):
    """Pure-JAX reference matching PyTorch eval-mode forward (unfused)."""
    h = (x - p["bn1_mean"]) / jnp.sqrt(p["bn1_var"] + EPS) * p["bn1_gamma"] + p["bn1_beta"]
    h = h @ p["w1"].T + p["b1"]
    h = (h - p["bn2_mean"]) / jnp.sqrt(p["bn2_var"] + EPS) * p["bn2_gamma"] + p["bn2_beta"]
    h = jnp.where(h >= 0, h, LEAKY_SLOPE * h)
    return h @ p["w2"].T + p["b2"]


if __name__ == "__main__":
    key = jax.random.PRNGKey(0)
    kx, kp, kx2, kx3 = jax.random.split(key, 4)

    # Small demo shapes consistent with the module.
    B, in_size, fil_num = 8, 32, 16
    x = jax.random.normal(kx, (B, in_size), jnp.float32)
    params = init_params(kp, in_size, fil_num)
    fused = fuse_params(params)   # BN folding hoisted: done once, reused below

    out = jax.block_until_ready(mlp_forward(x, fused))
    ref = _ref_forward(x, params)
    assert out.shape == (B, 1)
    assert jnp.allclose(out, ref, atol=1e-4, rtol=1e-4)

    # Non-multiple-of-8 batch handled as a single full-array block.
    B2 = 300
    x2 = jax.random.normal(kx2, (B2, in_size), jnp.float32)
    out2 = jax.block_until_ready(mlp_forward(x2, fused))
    assert out2.shape == (B2, 1)
    assert jnp.allclose(out2, _ref_forward(x2, params), atol=1e-4, rtol=1e-4)

    # Multi-step grid with a Pallas-masked partial edge block (tiling path).
    B3 = 3000
    x3 = jax.random.normal(kx3, (B3, in_size), jnp.float32)
    out3 = jax.block_until_ready(mlp_forward(x3, fused))
    assert out3.shape == (B3, 1)
    assert jnp.allclose(out3, _ref_forward(x3, params), atol=1e-4, rtol=1e-4)

    print("KERNEL_OK")
</pallas_src>

<mosaic_0001>
module attributes {stable_mosaic.version = 11 : i64} {
  func.func @_mlp_kernel(%arg0: i32, %arg1: memref<8x32xf32, #tpu.memory_space<vmem>>, %arg2: memref<32x128xf32, #tpu.memory_space<vmem>>, %arg3: memref<1x128xf32, #tpu.memory_space<vmem>>, %arg4: memref<1x128xf32, #tpu.memory_space<vmem>>, %arg5: memref<1xf32, #tpu.memory_space<smem>>, %arg6: memref<8x1xf32, #tpu.memory_space<vmem>>) attributes {dimension_semantics = [#tpu.dimension_semantics<parallel>], iteration_bounds = array<i64: 1>, scalar_prefetch = 0 : i64, scratch_operands = 0 : i64, tpu.core_type = #tpu.core_type<tc>, window_params = [{transform_indices = @transform_0, window_bounds = array<i64: 8, 32>}, {pipeline_mode = #tpu.pipeline_mode<synchronous>, transform_indices = @transform_1, window_bounds = array<i64: 32, 128>}, {pipeline_mode = #tpu.pipeline_mode<synchronous>, transform_indices = @transform_2, window_bounds = array<i64: 1, 128>}, {pipeline_mode = #tpu.pipeline_mode<synchronous>, transform_indices = @transform_3, window_bounds = array<i64: 1, 128>}, {transform_indices = @transform_4, window_bounds = array<i64: 1>}, {transform_indices = @transform_5, window_bounds = array<i64: 8, 1>}]} {
    %c0 = arith.constant 0 : index
    %c0_0 = arith.constant 0 : index
    %0 = vector.load %arg1[%c0, %c0_0] : memref<8x32xf32, #tpu.memory_space<vmem>>, vector<8x32xf32>
    %c0_1 = arith.constant 0 : index
    %c0_2 = arith.constant 0 : index
    %1 = vector.load %arg2[%c0_1, %c0_2] : memref<32x128xf32, #tpu.memory_space<vmem>>, vector<32x128xf32>
    %cst = arith.constant dense<0.000000e+00> : vector<8x128xf32>
    %2 = tpu.matmul %0, %1, %cst {dimension_numbers = #tpu.dot_dimension_numbers<[1], [0], [0], [1], [0, 0, 1, 1], [], []>} : vector<8x32xf32>, vector<32x128xf32>, vector<8x128xf32> -> vector<8x128xf32>
    %c0_3 = arith.constant 0 : index
    %c0_4 = arith.constant 0 : index
    %3 = vector.load %arg3[%c0_3, %c0_4] : memref<1x128xf32, #tpu.memory_space<vmem>>, vector<1x128xf32>
    %4 = vector.broadcast %3 : vector<1x128xf32> to vector<8x128xf32>
    %5 = arith.addf %2, %4 : vector<8x128xf32>
    %cst_5 = arith.constant 0.000000e+00 : f32
    %6 = vector.broadcast %cst_5 : f32 to vector<8x128xf32>
    %7 = arith.cmpf oge, %5, %6 : vector<8x128xf32>
    %cst_6 = arith.constant 0.00999999977 : f32
    %8 = vector.broadcast %cst_6 : f32 to vector<8x128xf32>
    %9 = arith.mulf %8, %5 : vector<8x128xf32>
    %10 = arith.select %7, %5, %9 : vector<8x128xi1>, vector<8x128xf32>
    %c0_7 = arith.constant 0 : index
    %c0_8 = arith.constant 0 : index
    %11 = vector.load %arg4[%c0_7, %c0_8] : memref<1x128xf32, #tpu.memory_space<vmem>>, vector<1x128xf32>
    %12 = vector.broadcast %11 : vector<1x128xf32> to vector<8x128xf32>
    %13 = arith.mulf %10, %12 : vector<8x128xf32>
    %cst_9 = arith.constant dense<0.000000e+00> : vector<8xf32>
    %14 = vector.multi_reduction <add>, %13, %cst_9 [1] : vector<8x128xf32> to vector<8xf32>
    %15 = vector.shape_cast %14 : vector<8xf32> to vector<8x1xf32>
    %c0_10 = arith.constant 0 : index
    %16 = memref.load %arg5[%c0_10] : memref<1xf32, #tpu.memory_space<smem>>
    %17 = vector.broadcast %16 : f32 to vector<8x1xf32>
    %18 = arith.addf %15, %17 : vector<8x1xf32>
    %c0_11 = arith.constant 0 : index
    %c0_12 = arith.constant 0 : index
    %19 = vector.load %arg6[%c0_11, %c0_12] : memref<8x1xf32, #tpu.memory_space<vmem>>, vector<8x1xf32>
    tpu.vector_store %arg6[%c0_11, %c0_12], %18 {strides = array<i32>} : memref<8x1xf32, #tpu.memory_space<vmem>>, vector<8x1xf32>,
    return
  }
  func.func @transform_0(%arg0: i32) -> (i32, i32) {
    %c0_i32 = arith.constant 0 : i32
    %c0_i32_0 = arith.constant 0 : i32
    return %arg0, %c0_i32 : i32, i32
  }
  func.func @transform_1(%arg0: i32) -> (i32, i32) {
    %c0_i32 = arith.constant 0 : i32
    %c0_i32_0 = arith.constant 0 : i32
    %c0_i32_1 = arith.constant 0 : i32
    return %c0_i32, %c0_i32_0 : i32, i32
  }
  func.func @transform_2(%arg0: i32) -> (i32, i32) {
    %c0_i32 = arith.constant 0 : i32
    %c0_i32_0 = arith.constant 0 : i32
    %c0_i32_1 = arith.constant 0 : i32
    return %c0_i32, %c0_i32_0 : i32, i32
  }
  func.func @transform_3(%arg0: i32) -> (i32, i32) {
    %c0_i32 = arith.constant 0 : i32
    %c0_i32_0 = arith.constant 0 : i32
    %c0_i32_1 = arith.constant 0 : i32
    return %c0_i32, %c0_i32_0 : i32, i32
  }
  func.func @transform_4(%arg0: i32) -> i32 {
    %c0_i32 = arith.constant 0 : i32
    %c0_i32_0 = arith.constant 0 : i32
    return %c0_i32 : i32
  }
  func.func @transform_5(%arg0: i32) -> (i32, i32) {
    %c0_i32 = arith.constant 0 : i32
    %c0_i32_0 = arith.constant 0 : i32
    return %arg0, %c0_i32 : i32, i32
  }
}

</mosaic_0001>

<bundles_post_ra>
// kernel: mlp_forward.1
= control target key start
LH: loop header
LB: loop body
LE: loop exit
PB: predicated region body
PF: predicated region fallthrough
CT: control target
= control target key end

     0   :  { %11 = vsyncpa [#allocation4], 0  ;;  %s317_s0 = inlined_call_operand.hbm [shape: f32[8,32], index: 0, kind: input, shape index: {}]   ;;  %s318_s1 = inlined_call_operand.hbm [shape: f32[32,128], index: 1, kind: input, shape index: {}]   ;;  %s319_s2 = inlined_call_operand.vmem [shape: f32[1,128], index: 2, kind: input, shape index: {}]   ;;  %s320_s3 = inlined_call_operand.vmem [shape: f32[1,128], index: 3, kind: input, shape index: {}]   ;;  %s321_s4 = inlined_call_operand.<no memory space> [shape: f32[1], index: 4, kind: input, shape index: {}]   ;;  %s322_s5 = inlined_call_operand.vmem [shape: f32[8,1], index: 5, kind: output, shape index: {}]  }
   0x1   :  { %12 = vsyncpa [#allocation6], 0  ;;  %s237_s18 = smov [#allocation3]   ;;  %s238_s20 = smov [#allocation5]  }
   0x2   :  { %s19_s19 = sshll.u32 %s237_s18, 4  ;;  %s28_s21 = sshll.u32 %s238_s20, 4  ;;  %s20_s19 = int_to_ptr.vmem [resolvable:$true] %s19_s19  ;;  %s274_s21 = int_to_ptr.vmem [resolvable:$true] %s28_s21 }
   0x3   :  { %s189_s24 = scalar_lea.hbm %s317_s0, 128 }
   0x4   :  { %p190_p0 = scmp.ne.s32.totalorder %s317_s0, %s189_s24  ;;  %p193_p1 = scmp.lt.u32.totalorder %s189_s24, %s317_s0 }
   0x6   :  { %p195_p2 = pnand %p193_p1, %p190_p0 }
   0x8   :  { %198 = shalt.err (!%p195_p2)
}
   0x9   :  { %s199_s29 = scalar_lea.vmem %s20_s19, 128  ;;  %p204_p4 = scmp.lt.s32.totalorder %s20_s19, %s20_s19 }
   0xa   :  { %p200_p3 = scmp.ne.s32.totalorder %s20_s19, %s199_s29  ;;  %p205_p5 = scmp.lt.s32.totalorder %s199_s29, %s199_s29 }
   0xc   :  { %p206_p6 = por %p205_p5, %p204_p4 }
   0xe   :  { %p207_p7 = pnand %p206_p6, %p200_p3 }
  0x10   :  { %210 = shalt.err (!%p207_p7)
}
  0x11   :  { %22 = dma.hbm_to_vmem [thread:$0]  %s317_s0, 128, %s20_s19, [#allocation4]  }
  0x12   :  { %s211_s9 = scalar_lea.hbm %s318_s1, 512 }
  0x13   :  { %p212_p8 = scmp.ne.s32.totalorder %s318_s1, %s211_s9  ;;  %p215_p9 = scmp.lt.u32.totalorder %s211_s9, %s318_s1 }
  0x15   :  { %p217_p10 = pnand %p215_p9, %p212_p8 }
  0x17   :  { %220 = shalt.err (!%p217_p10)
}
  0x18   :  { %s221_s14 = scalar_lea.vmem %s274_s21, 512  ;;  %p226_p12 = scmp.lt.s32.totalorder %s274_s21, %s274_s21 }
  0x19   :  { %p222_p11 = scmp.ne.s32.totalorder %s274_s21, %s221_s14  ;;  %p227_p13 = scmp.lt.s32.totalorder %s221_s14, %s221_s14 }
  0x1b   :  { %p228_p0 = por %p227_p13, %p226_p12 }
  0x1d   :  { %p229_p1 = pnand %p228_p0, %p222_p11 }
  0x1f   :  { %232 = shalt.err (!%p229_p1)
}
  0x20   :  { %s239_s0 = smov 128   ;;  %s240_s15 = smov 8  }
  0x21   :  { %34 = dma.hbm_to_vmem [thread:$0]  %s318_s1, 512, %s274_s21, [#allocation6], %s239_s0, %s239_s0, %s240_s15  }
  0x22   :  { %233 = dma.done.wait [#allocation4], 128  }
  0x23   :  { %234 = vsyncadd [#allocation4], 4294967168 }
  0x24   :  { %235 = dma.done.wait [#allocation6], 512  }
  0x25   :  { %236 = vsyncadd [#allocation6], 4294966784  ;;  %v241_v0 = vmov 0.0|0.0   ;;  %vm242_vm0 = vmmov 0   ;;  %v243_v1 = vmov 0.0   ;;  %v48_v2 = vld [vmem:[#allocation5] sm:$0xff]  ;;  %v147_v17 = vstv %s321_s4 }
  0x26   :  { %176 = vmatprep.subr.bf16.mxu0 %v241_v0  ;;  %173 = vmatprep.mubr.msk.f32.mxu0 %vm242_vm0, %v243_v1  ;;  %v49_v3 = vld [vmem:[#allocation5 + $0x8] sm:$0xff]  ;;  %v50_v4 = vld [vmem:[#allocation5 + $0x10] sm:$0xff]  ;;  %v51_v6 = vld [vmem:[#allocation5 + $0x18] sm:$0xff]  ;;  %vm59_vm1 = vcmask 261120   ;;  %vm149_vm3 = vcmask 7168  }
  0x27   :  { %v177_v5 = vpack.c.bf16 %v49_v3, %v48_v2  ;;  %v180_v7 = vpack.c.bf16 %v51_v6, %v50_v4  ;;  %v47_v8 = vld [vmem:[#allocation3] sm:$0xff] }
  0x28   :  { %v157_v9 = vld [vmem:[%s319_s2] ss:$0 sm:$0xff] }
  0x29   :  { %178 = vmatpush3.bf16.msra.mxu0 %v177_v5  ;;  %v159_v14 = vld [vmem:[%s320_s3] ss:$0 sm:$0xff] }
  0x2a   :  { %179 = vmatprep.subr.bf16.mxu0 %v241_v0 }
  0x2d   :  { %181 = vmatpush3.bf16.msra.mxu0 %v180_v7 }
  0x30   :  { %174 = vmatmul.mubr.msk.f32.vlgmr.msra.gmra.mrb[0].mxu0 %vm59_vm1, %v47_v8 }
 0x103   :  { %v129_v10 = vpop.f32.mrb[0].mxu0 }
 0x104   :  { %v130_v11 = vadd.f32 %v157_v9, %v129_v10  ;;  %v175_v12 = vpop.f32.mrb[1].mxu0 }
 0x106   :  { %v134_v13 = vmul.f32 0.01, %v130_v11  ;;  %vm133_vm2 = vcmp.ge.f32.partialorder %v130_v11, 0.0 }
 0x108   :  { %v135_v15 = vsel %vm133_vm2, %v130_v11, %v134_v13 }
 0x109   :  { %v143_v16 = vmul.f32 %v159_v14, %v135_v15 }
 0x10b   :  { %144 = vadd.xlane.f32.xlu0 %v143_v16 }
 0x198   :  { %v145_v18 = vpop.xlane.xlu0 %144 }
 0x199   :  { %v148_v19 = vadd.f32 %v147_v17, %v145_v18 }
 0x19b   :  { %150 = vst.msk [vmem:[%s322_s5] sm:$0xff] %vm149_vm3, %v148_v19 }
 0x19c   :  { %155 = vsyncpa [#allocation4], 1 }
 0x19d   :  { %156 = vsyncpa [#allocation6], 1 }

</bundles_post_ra>
